<compile_context>
chip_gen: v7x
topology: tpu7x:2x2x1
jax: 0.10.0
libtpu: 0.0.40
codegen_flags: <defaults>
</compile_context>

<pallas_src>
import jax
import jax.numpy as jnp
from jax.experimental import pallas as pl
from jax.experimental.pallas import tpu as pltpu


def ffn_kernel(x_ref, w1_ref, b1_ref, w2_ref, b2_ref, o_ref, acc_ref):
    """One (M-tile, d_ff-chunk) grid step.

    x_ref:  (TM, d_model)     w1_ref: (d_model, TF)   b1_ref: (1, TF)  f32
    w2_ref: (TF, d_model)     b2_ref: (1, d_model)    f32
    o_ref:  (TM, d_model)     acc_ref: (TM, d_model)  f32 scratch
    """
    f = pl.program_id(1)

    @pl.when(f == 0)
    def _init():
        # Fold b2 into the accumulator init -> epilogue is just cast + store.
        acc_ref[...] = jnp.broadcast_to(
            b2_ref[...].astype(jnp.float32), acc_ref.shape)

    # First GEMM + bias + ReLU for this d_ff chunk (f32 accumulation on MXU).
    h = jnp.dot(x_ref[...], w1_ref[...], preferred_element_type=jnp.float32)
    h = jnp.maximum(h + b1_ref[...], 0.0)

    # Second GEMM: accumulate this chunk's contribution into the resident tile.
    acc_ref[...] += jnp.dot(h.astype(w2_ref.dtype), w2_ref[...],
                            preferred_element_type=jnp.float32)

    @pl.when(f == pl.num_programs(1) - 1)
    def _finalize():
        o_ref[...] = acc_ref[...].astype(o_ref.dtype)


def _pick_ff_chunk(d_ff, target):
    """Largest multiple of 128 that divides d_ff and is <= target (or d_ff)."""
    if d_ff <= target:
        return d_ff
    for cand in range(target - target % 128, 127, -128):
        if d_ff % cand == 0:
            return cand
    return d_ff  # fall back to a single chunk


def positionwise_feed_forward(x, w1, b1, w2, b2, *, tm=256, tf=512,
                              compute_dtype=None, out_dtype=None):
    """x: (B, S, d_model). Weights stored (in, out) so the kernel does x @ W.

    compute_dtype: optional GEMM-input dtype (e.g. jnp.bfloat16) for x/W1/W2;
    accumulation and the bias/ReLU epilogue are always f32.
    """
    B, S, d_model = x.shape
    d_ff = w1.shape[1]
    assert w1.shape == (d_model, d_ff)
    assert w2.shape == (d_ff, d_model)
    M = B * S
    out_dtype = out_dtype if out_dtype is not None else x.dtype

    if compute_dtype is not None:
        x = x.astype(compute_dtype)
        w1 = w1.astype(compute_dtype)
        w2 = w2.astype(compute_dtype)
    b1 = b1.reshape(1, d_ff).astype(jnp.float32)
    b2 = b2.reshape(1, d_model).astype(jnp.float32)

    x2d = x.reshape(M, d_model)

    tm = M if M <= tm else tm                  # TM: default 256 (mult of 8) or full M
    tf = _pick_ff_chunk(d_ff, tf)              # TF divides d_ff; mult of 128 or d_ff
    grid = (pl.cdiv(M, tm), d_ff // tf)

    # Rough VMEM budget: double-buffered tiles + f32 accumulator; cap at 64 MiB
    # so the same setting is valid on v7x.
    in_b = jnp.dtype(x.dtype).itemsize
    w_b = jnp.dtype(w1.dtype).itemsize
    out_b = jnp.dtype(out_dtype).itemsize
    vmem_bytes = 2 * (tm * d_model * in_b          # x tile
                      + d_model * tf * w_b         # W1 chunk
                      + 8 * tf * 4                 # b1 chunk (sublane-padded)
                      + tf * d_model * w_b         # W2 chunk
                      + 8 * d_model * 4            # b2
                      + tm * d_model * out_b)      # out tile
    vmem_bytes += tm * d_model * 4                 # accumulator scratch
    vmem_limit = min(64 * 1024 * 1024,
                     max(16 * 1024 * 1024, int(1.5 * vmem_bytes) + (1 << 20)))

    flops = 4 * M * d_model * d_ff                 # two GEMMs, 2 flops/MAC
    bytes_accessed = (x2d.size * in_b + w1.size * w_b + w2.size * w_b
                      + b1.size * 4 + b2.size * 4 + M * d_model * out_b)

    out2d = pl.pallas_call(
        ffn_kernel,
        out_shape=jax.ShapeDtypeStruct((M, d_model), out_dtype),
        grid_spec=pltpu.PrefetchScalarGridSpec(
            num_scalar_prefetch=0,
            grid=grid,
            in_specs=[
                pl.BlockSpec((tm, d_model), lambda i, f: (i, 0)),   # x tile
                pl.BlockSpec((d_model, tf), lambda i, f: (0, f)),   # W1 chunk
                pl.BlockSpec((1, tf), lambda i, f: (0, f)),         # b1 chunk
                pl.BlockSpec((tf, d_model), lambda i, f: (f, 0)),   # W2 chunk
                pl.BlockSpec((1, d_model), lambda i, f: (0, 0)),    # b2
            ],
            out_specs=pl.BlockSpec((tm, d_model), lambda i, f: (i, 0)),
            scratch_shapes=[pltpu.VMEM((tm, d_model), jnp.float32)],
        ),
        compiler_params=pltpu.CompilerParams(
            dimension_semantics=("parallel", "arbitrary"),
            vmem_limit_bytes=vmem_limit),
        cost_estimate=pl.CostEstimate(
            flops=flops, transcendentals=0, bytes_accessed=bytes_accessed),
    )(x2d, w1, b1, w2, b2)

    return out2d.reshape(B, S, d_model)


def init_params(key, d_model, d_ff, dtype=jnp.float32):
    """Deterministic init mimicking nn.Linear's uniform(-1/sqrt(fan_in), ...)."""
    k1, k2, k3, k4 = jax.random.split(key, 4)
    lim1 = 1.0 / (d_model ** 0.5)
    lim2 = 1.0 / (d_ff ** 0.5)
    # Stored transposed relative to PyTorch: (in_features, out_features).
    w1 = jax.random.uniform(k1, (d_model, d_ff), dtype, -lim1, lim1)
    b1 = jax.random.uniform(k2, (1, d_ff), dtype, -lim1, lim1)
    w2 = jax.random.uniform(k3, (d_ff, d_model), dtype, -lim2, lim2)
    b2 = jax.random.uniform(k4, (1, d_model), dtype, -lim2, lim2)
    return w1, b1, w2, b2


if __name__ == "__main__":
    # Small, lane-dense demo shapes (production CleanDeepSC: d_model=768, d_ff=3072).
    B, S, d_model, d_ff = 2, 64, 128, 256
    key = jax.random.PRNGKey(0)
    kx, kp = jax.random.split(key)

    x = jax.random.normal(kx, (B, S, d_model), jnp.float32)
    w1, b1, w2, b2 = init_params(kp, d_model, d_ff)

    # Pure-JAX reference (inference: dropout == identity).
    ref = jnp.maximum(x @ w1 + b1, 0.0) @ w2 + b2

    # f32 path; tm=64, tf=128 -> grid (2, 2) exercises M tiling + d_ff accumulation.
    out = positionwise_feed_forward(x, w1, b1, w2, b2, tm=64, tf=128)
    out = jax.block_until_ready(out)
    assert out.shape == (B, S, d_model)
    assert jnp.allclose(out, ref, atol=1e-5, rtol=1e-5)

    # bf16-compute path (full-rate MXU on v6e/v7x), f32 accumulation; looser tol.
    out_bf16 = positionwise_feed_forward(x, w1, b1, w2, b2, tm=64, tf=128,
                                         compute_dtype=jnp.bfloat16)
    out_bf16 = jax.block_until_ready(out_bf16)
    assert out_bf16.shape == (B, S, d_model)
    assert jnp.allclose(out_bf16, ref, atol=5e-2, rtol=5e-2)

    print("KERNEL_OK")
</pallas_src>

<mosaic_0001>
module attributes {stable_mosaic.version = 11 : i64} {
  func.func @ffn_kernel(%arg0: i32, %arg1: i32, %arg2: memref<64x128xf32, #tpu.memory_space<vmem>>, %arg3: memref<128x128xf32, #tpu.memory_space<vmem>>, %arg4: memref<1x128xf32, #tpu.memory_space<vmem>>, %arg5: memref<128x128xf32, #tpu.memory_space<vmem>>, %arg6: memref<1x128xf32, #tpu.memory_space<vmem>>, %arg7: memref<64x128xf32, #tpu.memory_space<vmem>>, %arg8: memref<64x128xf32, #tpu.memory_space<vmem>>) attributes {dimension_semantics = [#tpu.dimension_semantics<parallel>, #tpu.dimension_semantics<arbitrary>], iteration_bounds = array<i64: 2, 2>, scalar_prefetch = 0 : i64, scratch_operands = 1 : i64, tpu.core_type = #tpu.core_type<tc>, window_params = [{transform_indices = @transform_0, window_bounds = array<i64: 64, 128>}, {transform_indices = @transform_1, window_bounds = array<i64: 128, 128>}, {transform_indices = @transform_2, window_bounds = array<i64: 1, 128>}, {transform_indices = @transform_3, window_bounds = array<i64: 128, 128>}, {pipeline_mode = #tpu.pipeline_mode<synchronous>, transform_indices = @transform_4, window_bounds = array<i64: 1, 128>}, {transform_indices = @transform_5, window_bounds = array<i64: 64, 128>}]} {
    %c0_i32 = arith.constant 0 : i32
    %0 = arith.cmpi eq, %arg1, %c0_i32 : i32
    %1 = arith.extui %0 : i1 to i32
    %c0_i32_0 = arith.constant 0 : i32
    %2 = arith.cmpi ne, %1, %c0_i32_0 : i32
    scf.if %2 {
      %c0_15 = arith.constant 0 : index
      %c0_16 = arith.constant 0 : index
      %19 = vector.load %arg6[%c0_15, %c0_16] : memref<1x128xf32, #tpu.memory_space<vmem>>, vector<1x128xf32>
      %20 = vector.shape_cast %19 : vector<1x128xf32> to vector<1x128xf32>
      %21 = vector.broadcast %20 : vector<1x128xf32> to vector<64x128xf32>
      %c0_17 = arith.constant 0 : index
      %c0_18 = arith.constant 0 : index
      %22 = vector.load %arg8[%c0_17, %c0_18] : memref<64x128xf32, #tpu.memory_space<vmem>>, vector<64x128xf32>
      tpu.vector_store %arg8[%c0_17, %c0_18], %21 {strides = array<i32>} : memref<64x128xf32, #tpu.memory_space<vmem>>, vector<64x128xf32>,
    } else {
    }
    %c0 = arith.constant 0 : index
    %c0_1 = arith.constant 0 : index
    %3 = vector.load %arg2[%c0, %c0_1] : memref<64x128xf32, #tpu.memory_space<vmem>>, vector<64x128xf32>
    %c0_2 = arith.constant 0 : index
    %c0_3 = arith.constant 0 : index
    %4 = vector.load %arg3[%c0_2, %c0_3] : memref<128x128xf32, #tpu.memory_space<vmem>>, vector<128x128xf32>
    %cst = arith.constant dense<0.000000e+00> : vector<64x128xf32>
    %5 = tpu.matmul %3, %4, %cst {dimension_numbers = #tpu.dot_dimension_numbers<[1], [0], [0], [1], [0, 0, 1, 1], [], []>} : vector<64x128xf32>, vector<128x128xf32>, vector<64x128xf32> -> vector<64x128xf32>
    %c0_4 = arith.constant 0 : index
    %c0_5 = arith.constant 0 : index
    %6 = vector.load %arg4[%c0_4, %c0_5] : memref<1x128xf32, #tpu.memory_space<vmem>>, vector<1x128xf32>
    %7 = vector.broadcast %6 : vector<1x128xf32> to vector<64x128xf32>
    %8 = arith.addf %5, %7 : vector<64x128xf32>
    %cst_6 = arith.constant 0.000000e+00 : f32
    %9 = vector.broadcast %cst_6 : f32 to vector<64x128xf32>
    %10 = arith.maximumf %8, %9 : vector<64x128xf32>
    %c0_7 = arith.constant 0 : index
    %c0_8 = arith.constant 0 : index
    %11 = vector.load %arg8[%c0_7, %c0_8] : memref<64x128xf32, #tpu.memory_space<vmem>>, vector<64x128xf32>
    %c0_9 = arith.constant 0 : index
    %c0_10 = arith.constant 0 : index
    %12 = vector.load %arg5[%c0_9, %c0_10] : memref<128x128xf32, #tpu.memory_space<vmem>>, vector<128x128xf32>
    %cst_11 = arith.constant dense<0.000000e+00> : vector<64x128xf32>
    %13 = tpu.matmul %10, %12, %cst_11 {dimension_numbers = #tpu.dot_dimension_numbers<[1], [0], [0], [1], [0, 0, 1, 1], [], []>} : vector<64x128xf32>, vector<128x128xf32>, vector<64x128xf32> -> vector<64x128xf32>
    %14 = arith.addf %11, %13 : vector<64x128xf32>
    %c0_12 = arith.constant 0 : index
    %c0_13 = arith.constant 0 : index
    %15 = vector.load %arg8[%c0_12, %c0_13] : memref<64x128xf32, #tpu.memory_space<vmem>>, vector<64x128xf32>
    tpu.vector_store %arg8[%c0_12, %c0_13], %14 {strides = array<i32>} : memref<64x128xf32, #tpu.memory_space<vmem>>, vector<64x128xf32>,
    %c1_i32 = arith.constant 1 : i32
    %16 = arith.cmpi eq, %arg1, %c1_i32 : i32
    %17 = arith.extui %16 : i1 to i32
    %c0_i32_14 = arith.constant 0 : i32
    %18 = arith.cmpi ne, %17, %c0_i32_14 : i32
    scf.if %18 {
      %c0_15 = arith.constant 0 : index
      %c0_16 = arith.constant 0 : index
      %19 = vector.load %arg8[%c0_15, %c0_16] : memref<64x128xf32, #tpu.memory_space<vmem>>, vector<64x128xf32>
      %c0_17 = arith.constant 0 : index
      %c0_18 = arith.constant 0 : index
      %20 = vector.load %arg7[%c0_17, %c0_18] : memref<64x128xf32, #tpu.memory_space<vmem>>, vector<64x128xf32>
      tpu.vector_store %arg7[%c0_17, %c0_18], %19 {strides = array<i32>} : memref<64x128xf32, #tpu.memory_space<vmem>>, vector<64x128xf32>,
    } else {
    }
    return
  }
  func.func @transform_0(%arg0: i32, %arg1: i32) -> (i32, i32) {
    %c0_i32 = arith.constant 0 : i32
    %c0_i32_0 = arith.constant 0 : i32
    return %arg0, %c0_i32 : i32, i32
  }
  func.func @transform_1(%arg0: i32, %arg1: i32) -> (i32, i32) {
    %c0_i32 = arith.constant 0 : i32
    %c0_i32_0 = arith.constant 0 : i32
    return %c0_i32, %arg1 : i32, i32
  }
  func.func @transform_2(%arg0: i32, %arg1: i32) -> (i32, i32) {
    %c0_i32 = arith.constant 0 : i32
    %c0_i32_0 = arith.constant 0 : i32
    return %c0_i32, %arg1 : i32, i32
  }
  func.func @transform_3(%arg0: i32, %arg1: i32) -> (i32, i32) {
    %c0_i32 = arith.constant 0 : i32
    %c0_i32_0 = arith.constant 0 : i32
    return %arg1, %c0_i32 : i32, i32
  }
  func.func @transform_4(%arg0: i32, %arg1: i32) -> (i32, i32) {
    %c0_i32 = arith.constant 0 : i32
    %c0_i32_0 = arith.constant 0 : i32
    %c0_i32_1 = arith.constant 0 : i32
    return %c0_i32, %c0_i32_0 : i32, i32
  }
  func.func @transform_5(%arg0: i32, %arg1: i32) -> (i32, i32) {
    %c0_i32 = arith.constant 0 : i32
    %c0_i32_0 = arith.constant 0 : i32
    return %arg0, %c0_i32 : i32, i32
  }
}

</mosaic_0001>

<bundles_post_ra>
// kernel: tpu_custom_call.1
= control target key start
LH: loop header
LB: loop body
LE: loop exit
PB: predicated region body
PF: predicated region fallthrough
CT: control target
= control target key end

     0   :  { %s1862_s0 = inlined_call_operand.hbm [shape: f32[128,128], index: 0, kind: input, shape index: {}]   ;;  %s1863_s1 = inlined_call_operand.hbm [shape: f32[128,256], index: 1, kind: input, shape index: {}]   ;;  %s1864_s2 = inlined_call_operand.vmem [shape: f32[1,256], index: 2, kind: input, shape index: {}]   ;;  %s1865_s3 = inlined_call_operand.hbm [shape: f32[256,128], index: 3, kind: input, shape index: {}]   ;;  %s1866_s4 = inlined_call_operand.vmem [shape: f32[1,128], index: 4, kind: input, shape index: {}]   ;;  %s1867_s5 = inlined_call_operand.hbm [shape: f32[128,128], index: 5, kind: output, shape index: {}]  }
   0x1   :  { %1884 = sst [smem:[#allocation21_spill]] %s1863_s1 }
   0x2   :  { %1885 = sst [smem:[#allocation22_spill]] %s1866_s4 }
   0x3   :  { %1886 = sst [smem:[#allocation23_spill]] %s1867_s5 }
   0x4   :  { %10 = vsyncpa [#allocation4], 0 }
   0x5   :  { %12 = vsyncpa [#allocation4 + $0x1], 0 }
   0x6   :  { %13 = vsyncpa [#allocation7], 0 }
   0x7   :  { %15 = vsyncpa [#allocation7 + $0x1], 0 }
   0x8   :  { %16 = vsyncpa [#allocation5], 0 }
   0x9   :  { %18 = vsyncpa [#allocation5 + $0x1], 0  ;;  %s1429_s18 = smov 0   ;;  %s1431_s19 = smov 0  }
   0xa   :  { %s1433_s20 = smov 0   ;;  %s1435_s21 = smov 0  }
   0xb   :  { %s1437_s22 = smov 0   ;;  %s1439_s23 = smov 0  }
   0xc   :  { %s1441_s24 = smov 0   ;;  %s1443_s25 = smov 0  }
   0xd   :  { %s1445_s26 = smov 0   ;;  %s1447_s27 = smov 0  }
   0xe   :  { %s1449_s28 = smov 0  }
   0xf LB: > { %1887 = sst [smem:[#allocation13_spill]] %s1356_s20  ;;  %s33_s29 = sadd.s32 1, %s1380_s26  ;;  %s1388_s28 = sphi %s1449_s28, %s24_s28   ;;  %s1384_s27 = sphi %s1447_s27, %s1927_s27   ;;  %s1380_s26 = sphi %s1445_s26, %s1933_s26   ;;  %s1376_s25 = sphi %s1443_s25, %s1925_s25   ;;  %s1372_s24 = sphi %s1441_s24, %s1932_s24   ;;  %s1368_s23 = sphi %s1439_s23, %s1924_s23   ;;  %s1364_s22 = sphi %s1437_s22, %s1931_s22   ;;  %s1360_s21 = sphi %s1435_s21, %s1930_s21   ;;  %s1356_s20 = sphi %s1433_s20, %s1922_s20   ;;  %s1352_s19 = sphi %s1431_s19, %s1929_s19   ;;  %s1348_s18 = sphi %s1429_s18, %s1928_s18  }
  0x10   : > { %1888 = sst [smem:[#allocation14_spill]] %s1368_s23  ;;  %p1870_p0 = scmp.eq.s32.totalorder %s1388_s28, 0 }
  0x11   : > { %1889 = sst [smem:[#allocation15_spill]] %s1376_s25  ;;  %p1486_p1 = scmp.ge.s32.totalorder %s33_s29, 2 }
  0x12   : > { %1890 = sst [smem:[#allocation16_spill]] %s1384_s27  ;;  %s69_s6 = sadd.s32 1, %s1356_s20 }
  0x13   : > { %p76_p2 = scmp.ne.s32.totalorder %s1356_s20, %s1352_s19  ;;  %s1935_s29 = smov (%p1486_p1, %s33_s29), 0 }
  0x14   : > { %1892 = sst [smem:[#allocation17_spill]] %s1935_s29  ;;  %s66_s7 = ssub.s32 %s1380_s26, %s1935_s29 }
  0x15   : > { %p78_p4 = por %p76_p2, %p1870_p0  ;;  %p1869_p5 = scmp.lt.s32.totalorder %s1388_s28, 4 }
  0x16   : > { %p67_p6 = scmp.eq.s32.totalorder %s66_s7, 0  ;;  %s229_s8 = sand.u32 1, %s1388_s28  }
  0x17   : > { %s231_s10 = sand.u32 1, %s1356_s20   ;;  %s834_s12 = sshll.u32 %s1380_s26, 7 }
  0x18   : > { %s1506_s9 = scalar_select %p67_p6, %s1356_s20, %s69_s6  }
  0x19   : > { %s1509_s11 = sshll.u32 %s231_s10, 7  ;;  %s1894_s1 = sld [smem:[#allocation21_spill]] }
  0x1a   : > { %1893 = sst [smem:[#allocation18_spill]] %s1506_s9  ;;  %s233_s16 = scalar_lea.vmem [#allocation6], %s1509_s11 }
  0x1b   : > { %s239_s17 = sshll.u32 %s233_s16, 4  ;;  %p1520_p7 = pnand %p1869_p5, %p78_p4  ;;  %s1524_s17 = int_to_ptr.vmem [resolvable:$true] %s239_s17 }
  0x1c   : > { %s1527_s7 = scalar_lea.sflag [#allocation7], %s229_s8 }
  0x1d   : > { %p1873_p10 = pneg %p1520_p7 }
  0x1f   : > { %s1515_s15 = scalar_lea.hbm %s1894_s1, %s834_s12  ;;  %s1177_s14 = scalar_lea.hbm %s1894_s1, 4096 }
  0x20   : > { %s1172_s10 = scalar_lea.hbm %s1515_s15, 2048  ;;  %p1178_p13 = scmp.lt.u32.totalorder %s1515_s15, %s1894_s1 }
  0x21   : > { %p1173_p9 = scmp.ne.s32.totalorder %s1515_s15, %s1172_s10  ;;  %p1179_p2 = scmp.lt.u32.totalorder %s1177_s14, %s1172_s10 }
  0x22   : > { %p1181_p6 = scmp.lt.u32.totalorder %s1172_s10, %s1515_s15 }
  0x23   : > { %p1175_p11 = pnand %p1873_p10, %p1173_p9  ;;  %p1180_p4 = por %p1179_p2, %p1178_p13 }
  0x25   : > { %p1176_p12 = pneg %p1175_p11  ;;  %p1182_p5 = por %p1181_p6, %p1180_p4 }
  0x27   : > { %p1183_p3 = pnand %p1182_p5, %p1176_p12 }
  0x29   : > { %1186 = shalt.err (!%p1183_p3)
}
  0x2a   : > { %s1187_s8 = scalar_lea.vmem %s1524_s17, 2048  ;;  %s1390_s12 = smov [#allocation6]  }
  0x2b   : > { %p1188_p9 = scmp.ne.s32.totalorder %s1524_s17, %s1187_s8  ;;  %s1192_s13 = sshll.u32 %s1390_s12, 4  ;;  %s1193_s13 = int_to_ptr.vmem [resolvable:$false] %s1192_s13 }
  0x2c   : > { %s1194_s29 = scalar_lea.vmem %s1193_s13, 4096  ;;  %p1195_p8 = scmp.lt.s32.totalorder %s1524_s17, %s1193_s13 }
  0x2d   : > { %p1190_p11 = pnand %p1188_p9, %p1873_p10  ;;  %p1196_p13 = scmp.lt.s32.totalorder %s1194_s29, %s1187_s8 }
  0x2f   : > { %p1191_p0 = pneg %p1190_p11  ;;  %p1197_p2 = por %p1196_p13, %p1195_p8 }
  0x31   : > { %p1198_p4 = pnand %p1197_p2, %p1191_p0 }
  0x33   : > { %1201 = shalt.err (!%p1198_p4)
}
  0x34   : > { %s1391_s10 = smov 256   ;;  %s1871_s14 = smov 128  }
  0x35   : > { %s1874_s16 = smov 8   ;;  %p274_p0 = scmp.lt.s32.totalorder %s1388_s28, 5 }
  0x36   : > { %1069 = dma.hbm_to_vmem [thread:$0]  (!%p1520_p7), %s1515_s15, 2048, %s1524_s17, %s1527_s7, %s1391_s10, %s1871_s14, %s1874_s16  }
  0x37   : > { %p1896_p3 = scmp.ge.s32.totalorder %s1388_s28, 1  ;;  %s1565_s12 = sadd.s32 4294967295, %s1388_s28  }
  0x38   : > { %s827_s13 = sadd.s32 4294967294, %s1388_s28   ;;  %s36_s29 = sadd.s32 1, %s1384_s27 }
  0x39   : > { %p1560_p5 = pnand %p1896_p3, %p274_p0  ;;  %s43_s1 = sadd.s32 1, %s1368_s23 }
  0x3a   : > { %s1937_s29 = smov (!%p1486_p1, %s36_s29), %s1384_s27  ;;  %p50_p8 = scmp.ne.s32.totalorder %s1368_s23, %s1364_s22 }
  0x3b   : > { %s1897_s8 = scalar_select %p1560_p5, 1, 0 }
  0x3c   : > { %p56_p12 = scmp.ne.s32.totalorder %s1364_s22, %s1360_s21  ;;  %p38_p6 = scmp.ge.s32.totalorder %s1937_s29, 2 }
  0x3d   : > { %p57_p9 = scmp.eq.s32.totalorder %s1565_s12, 0  ;;  %p1898_p11 = scmp.eq.s32.totalorder %s1388_s28, 0 }
  0x3e   : > { %p179_p2 = scmp.eq.s32.totalorder %s1565_s12, 3  ;;  %s1939_s29 = smov (%p38_p6, %s1937_s29), 0 }
  0x3f   : > { %p1580_p13 = por %p1898_p11, %p50_p8  ;;  %1900 = sst [smem:[#allocation19_spill]] %s1939_s29 }
  0x40   : > { %p1590_p1 = por %p57_p9, %p56_p12  ;;  %p1902_p4 = scmp.ne.s32.totalorder %s1352_s19, %s1348_s18 }
  0x41   : > { %s40_s10 = ssub.s32 %s1384_s27, %s1939_s29  ;;  %p1603_p3 = por %p179_p2, %p50_p8 }
  0x42   : > { %s1901_s30 = scalar_select %p1590_p1, 1, 0 }
  0x43   : > { %p1597_p0 = por %p1902_p4, %p57_p9  ;;  %p41_p11 = scmp.eq.s32.totalorder %s40_s10, 0 }
  0x44   : > { %s1904_s14 = scalar_select %p1603_p3, 1, 0 }
  0x45   : > { %s1903_s17 = scalar_select %p1597_p0, 1, 0 }
  0x46   : > { %p185_p10 = scmp.eq.s32.totalorder %s827_s13, 3  ;;  %s208_s16 = sand.u32 1, %s1368_s23  }
  0x47   : > { %s852_s9 = sshll.u32 %s1384_s27, 10  ;;  %s830_s18 = sshll.u32 %s208_s16, 6 }
  0x48   : > { %s1610_s20 = scalar_select %p41_p11, %s1368_s23, %s43_s1  }
  0x49   : > { %p1615_p6 = por %p185_p10, %p56_p12  ;;  %s1622_s29 = scalar_lea.hbm %s1862_s0, %s852_s9 }
  0x4a   : > { %1905 = sst [smem:[#allocation20_spill]] %s1610_s20  ;;  %p1907_p8 = scmp.lt.s32.totalorder %s1388_s28, 4 }
  0x4b   : > { %s1906_s5 = scalar_select %p1615_p6, 1, 0 }
  0x4c   : > { %p1628_p9 = pnand %p1907_p8, %p1580_p13  ;;  %s212_s13 = scalar_lea.vmem [#allocation3], %s830_s18 }
  0x4d   : > { %s219_s10 = sshll.u32 %s212_s13, 4  ;;  %s1634_s27 = scalar_lea.sflag [#allocation4], %s208_s16  ;;  %s1632_s10 = int_to_ptr.vmem [resolvable:$true] %s219_s10 }
  0x4e   : > { %s1202_s4 = scalar_lea.hbm %s1622_s29, 1024  ;;  %p1204_p12 = pneg %p1628_p9 }
  0x4f   : > { %p1203_p10 = scmp.ne.s32.totalorder %s1622_s29, %s1202_s4  ;;  %s1207_s15 = scalar_lea.hbm %s1862_s0, 2048 }
  0x50   : > { %p1208_p13 = scmp.lt.u32.totalorder %s1622_s29, %s1862_s0  ;;  %p1209_p11 = scmp.lt.u32.totalorder %s1207_s15, %s1202_s4 }
  0x51   : > { %p1205_p2 = pnand %p1204_p12, %p1203_p10  ;;  %p1211_p6 = scmp.lt.u32.totalorder %s1202_s4, %s1622_s29 }
  0x52   : > { %p1210_p8 = por %p1209_p11, %p1208_p13 }
  0x53   : > { %p1206_p4 = pneg %p1205_p2 }
  0x54   : > { %p1212_p3 = por %p1211_p6, %p1210_p8 }
  0x56   : > { %p1213_p0 = pnand %p1212_p3, %p1206_p4 }
  0x58   : > { %1216 = shalt.err (!%p1213_p0)
}
  0x59   : > { %s1217_s16 = scalar_lea.vmem %s1632_s10, 1024  ;;  %s1394_s18 = smov [#allocation3]  }
  0x5a   : > { %p1218_p10 = scmp.ne.s32.totalorder %s1632_s10, %s1217_s16  ;;  %s1222_s13 = sshll.u32 %s1394_s18, 4  ;;  %s1223_s13 = int_to_ptr.vmem [resolvable:$false] %s1222_s13 }
  0x5b   : > { %s1224_s20 = scalar_lea.vmem %s1223_s13, 2048  ;;  %p1225_p5 = scmp.lt.s32.totalorder %s1632_s10, %s1223_s13 }
  0x5c   : > { %p1220_p2 = pnand %p1218_p10, %p1204_p12  ;;  %p1226_p13 = scmp.lt.s32.totalorder %s1224_s20, %s1217_s16 }
  0x5e   : > { %p1221_p1 = pneg %p1220_p2  ;;  %p1227_p11 = por %p1226_p13, %p1225_p5 }
  0x60   : > { %p1228_p6 = pnand %p1227_p11, %p1221_p1 }
  0x62   : > { %1231 = shalt.err (!%p1228_p6)
}
  0x63   : > { %s1909_s23 = smov 8   ;;  %s1910_s4 = smov 128  }
  0x64   : > { %1066 = dma.hbm_to_vmem [thread:$0]  (!%p1628_p9), %s1622_s29, 1024, %s1632_s10, %s1634_s27, %s1910_s4, %s1910_s4, %s1909_s23  }
  0x65   : > { %s853_s25 = sshll.u32 %s1380_s26, 11  ;;  %s259_s9 = scalar_lea.vmem [#allocation8], %s1509_s11 }
  0x66   : > { %s266_s15 = sshll.u32 %s259_s9, 4  ;;  %s1670_s13 = scalar_lea.hbm %s1865_s3, %s853_s25  ;;  %s1672_s15 = int_to_ptr.vmem [resolvable:$true] %s266_s15 }
  0x67   : > { %s1232_s1 = scalar_lea.hbm %s1670_s13, 2048  ;;  %p1911_p1 = pneg %p1520_p7 }
  0x68   : > { %p1233_p5 = scmp.ne.s32.totalorder %s1670_s13, %s1232_s1  ;;  %s1237_s29 = scalar_lea.hbm %s1865_s3, 4096 }
  0x69   : > { %p1238_p9 = scmp.lt.u32.totalorder %s1670_s13, %s1865_s3  ;;  %p1239_p12 = scmp.lt.u32.totalorder %s1237_s29, %s1232_s1 }
  0x6a   : > { %p1235_p0 = pnand %p1233_p5, %p1911_p1  ;;  %p1241_p8 = scmp.lt.u32.totalorder %s1232_s1, %s1670_s13 }
  0x6b   : > { %p1240_p4 = por %p1239_p12, %p1238_p9 }
  0x6c   : > { %p1236_p3 = pneg %p1235_p0 }
  0x6d   : > { %p1242_p10 = por %p1241_p8, %p1240_p4 }
  0x6f   : > { %p1243_p2 = pnand %p1242_p10, %p1236_p3 }
  0x71   : > { %1246 = shalt.err (!%p1243_p2)
}
  0x72   : > { %s1247_s25 = scalar_lea.vmem %s1672_s15, 2048  ;;  %p1912_p11 = pmov %p1911_p1 }
  0x73   : > { %p1248_p13 = scmp.ne.s32.totalorder %s1672_s15, %s1247_s25  ;;  %s1395_s9 = smov [#allocation8]  }
  0x74   : > { %s1252_s18 = sshll.u32 %s1395_s9, 4  ;;  %s1253_s18 = int_to_ptr.vmem [resolvable:$false] %s1252_s18 }
  0x75   : > { %p1250_p6 = pnand %p1248_p13, %p1912_p11  ;;  %s1254_s16 = scalar_lea.vmem %s1253_s18, 4096 }
  0x76   : > { %p1255_p1 = scmp.lt.s32.totalorder %s1672_s15, %s1253_s18  ;;  %p1256_p0 = scmp.lt.s32.totalorder %s1254_s16, %s1247_s25 }
  0x77   : > { %p1251_p5 = pneg %p1250_p6 }
  0x78   : > { %p1257_p9 = por %p1256_p0, %p1255_p1 }
  0x7a   : > { %p1258_p12 = pnand %p1257_p9, %p1251_p5 }
  0x7c   : > { %1261 = shalt.err (!%p1258_p12)
}
  0x7d   : > { %1072 = dma.hbm_to_vmem [thread:$0]  (!%p1520_p7), %s1670_s13, 2048, %s1672_s15, %s1527_s7, %s1910_s4, %s1910_s4, %s1909_s23  }
  0x7e   : > { %p1913_p3 = scmp.ne.s32.totalorder %s1897_s8, 0 }
  0x7f   : > { %s1704_s1 = sand.u32 (!%p1913_p3), 1, %s1364_s22   ;;  %p1914_p4 = scmp.ne.s32.totalorder (!%p1913_p3), %s1901_s30, 0 }
  0x80   : > { %278 = sbr.rel (%p1913_p3) target bundleno = 672 (0x2a0), region = 40  ;;  %s839_s27 = sshll.u32 (!%p1913_p3), %s1704_s1, 6 }
  0x81   : > { %s281_s11 = scalar_lea.sflag (!%p1913_p3), [#allocation4], %s1704_s1  ;;  %s1708_s29 = scalar_lea.vmem (!%p1913_p3), [#allocation3], %s839_s27 }
  0x87   : > { %1335 = dma.done.wait (%p1914_p4), %s281_s11, 1024  }
  0x88   : > { %1337 = vsyncadd (%p1914_p4), %s281_s11, 4294966272  ;;  %s289_s6 = sand.u32 1, %s1565_s12   ;;  %s291_s7 = sand.u32 1, %s1352_s19  }
  0x89   : > { %s840_s8 = sshll.u32 %s291_s7, 7  ;;  %s290_s23 = scalar_lea.sflag [#allocation7], %s289_s6 }
  0x8a   : > { %s1716_s4 = scalar_lea.vmem [#allocation6], %s840_s8  ;;  %p1915_p7 = scmp.ne.s32.totalorder %s1903_s17, 0 }
  0x8c   : > { %1339 = dma.done.wait (%p1915_p7), %s290_s23, 4096  }
  0x8d   : > { %1341 = vsyncadd (%p1915_p7), %s290_s23, 4294963200  ;;  %p343_p8 = scmp.lt.s32.totalorder %s1372_s24, 1  ;;  %s1730_s10 = scalar_lea.vmem [#allocation8], %s840_s8 }
  0x8e   : > { %s1732_s20 = scalar_lea.vmem [#allocation9], %s839_s27  ;;  %p843_p10 = scmp.ne.s32.totalorder %s1372_s24, 0 }
  0x8f   : > { %s1724_s15 = scalar_select %p343_p8, %s1372_s24, 1 }
  0x90   : > { %351 = sbr.rel (%p843_p10) target bundleno = 155 (0x9b), region = 56  ;;  %s1916_s9 = sld [smem:[#allocation22_spill]] (!%p843_p10) }
  0x91   : > { %s345_s12 = scalar_lea.vmem %s1864_s2, %s1724_s15 }
  0x96   : > { %v844_v0 = vld [vmem:[%s1916_s9] ss:$0 sm:$0xff] (!%p843_p10) }
  0x97   : > { %359 = vst [vmem:[#allocation2] sm:$0xff] %v844_v0  ;;  %360 = vst [vmem:[#allocation2 + $0x8] sm:$0xff] %v844_v0 }
  0x98   : > { %361 = vst [vmem:[#allocation2 + $0x10] sm:$0xff] %v844_v0  ;;  %362 = vst [vmem:[#allocation2 + $0x18] sm:$0xff] %v844_v0 }
  0x99   : > { %363 = vst [vmem:[#allocation2 + $0x20] sm:$0xff] %v844_v0  ;;  %364 = vst [vmem:[#allocation2 + $0x28] sm:$0xff] %v844_v0 }
  0x9a   : > { %365 = vst [vmem:[#allocation2 + $0x30] sm:$0xff] %v844_v0  ;;  %366 = vst [vmem:[#allocation2 + $0x38] sm:$0xff] %v844_v0 }
  0x9b PF: > { %v375_v1 = vld [vmem:[%s1716_s4] sm:$0xff]  ;;  %v376_v2 = vld [vmem:[%s1716_s4 + $0x8] sm:$0xff]  ;;  %v377_v3 = vld [vmem:[%s1716_s4 + $0x10] sm:$0xff]  ;;  %p846_p2 = scmp.ne.s32.totalorder %s1372_s24, 1 }
  0x9c   : > { %v991_v4 = vpack.c.bf16 %v376_v2, %v375_v1  ;;  %v378_v5 = vld [vmem:[%s1716_s4 + $0x18] sm:$0xff]  ;;  %v379_v7 = vld [vmem:[%s1716_s4 + $0x20] sm:$0xff]  ;;  %v380_v8 = vld [vmem:[%s1716_s4 + $0x28] sm:$0xff] }
  0x9d   : > { %v995_v6 = vpack.c.bf16 %v378_v5, %v377_v3  ;;  %v999_v9 = vpack.c.bf16 %v380_v8, %v379_v7  ;;  %v367_v10 = vld [vmem:[%s1708_s29] sm:$0xff]  ;;  %v381_v11 = vld [vmem:[%s1716_s4 + $0x30] sm:$0xff]  ;;  %v382_v12 = vld [vmem:[%s1716_s4 + $0x38] sm:$0xff] }
  0x9e   : > { %992 = vmatprep.subr.bf16.mxu0 %v991_v4  ;;  %935 = vmatprep.mubr.f32.mxu0 %v367_v10  ;;  %v519_v13 = vld [vmem:[%s1730_s10] sm:$0xff]  ;;  %v520_v14 = vld [vmem:[%s1730_s10 + $0x8] sm:$0xff]  ;;  %v521_v15 = vld [vmem:[%s1730_s10 + $0x10] sm:$0xff]  ;;  %v1003_v16 = vpack.c.bf16 %v382_v12, %v381_v11 }
  0x9f   : > { %994 = vmatpush3.bf16.msra.mxu0 %v991_v4  ;;  %v383_v17 = vld [vmem:[%s1716_s4 + $0x40] sm:$0xff]  ;;  %v1023_v18 = vpack.c.bf16 %v520_v14, %v519_v13  ;;  %v522_v19 = vld [vmem:[%s1730_s10 + $0x18] sm:$0xff]  ;;  %v384_v20 = vld [vmem:[%s1716_s4 + $0x48] sm:$0xff] }
  0xa0   : > { %996 = vmatprep.subr.bf16.mxu0 %v995_v6  ;;  %v1027_v21 = vpack.c.bf16 %v522_v19, %v521_v15  ;;  %v523_v22 = vld [vmem:[%s1730_s10 + $0x20] sm:$0xff]  ;;  %v524_v23 = vld [vmem:[%s1730_s10 + $0x28] sm:$0xff]  ;;  %v1007_v24 = vpack.c.bf16 %v384_v20, %v383_v17  ;;  %v385_v25 = vld [vmem:[%s1716_s4 + $0x50] sm:$0xff] }
  0xa1   : > { %1024 = vmatprep.subr.bf16.mxu1 %v1023_v18  ;;  %v1031_v26 = vpack.c.bf16 %v524_v23, %v523_v22  ;;  %v386_v27 = vld [vmem:[%s1716_s4 + $0x58] sm:$0xff]  ;;  %v525_v28 = vld [vmem:[%s1730_s10 + $0x30] sm:$0xff]  ;;  %v387_v31 = vld [vmem:[%s1716_s4 + $0x60] sm:$0xff] }
  0xa2   : > { %1026 = vmatpush3.bf16.msra.mxu1 %v1023_v18  ;;  %v526_v29 = vld [vmem:[%s1730_s10 + $0x38] sm:$0xff]  ;;  %v1011_v30 = vpack.c.bf16 %v386_v27, %v385_v25  ;;  %v388_v33 = vld [vmem:[%s1716_s4 + $0x68] sm:$0xff]  ;;  %v527_v34 = vld [vmem:[%s1730_s10 + $0x40] sm:$0xff] }
  0xa3   : > { %998 = vmatpush3.bf16.msra.mxu0 %v995_v6  ;;  %1028 = vmatprep.subr.bf16.mxu1 %v1027_v21  ;;  %v1035_v32 = vpack.c.bf16 %v526_v29, %v525_v28  ;;  %v528_v35 = vld [vmem:[%s1730_s10 + $0x48] sm:$0xff]  ;;  %v1015_v36 = vpack.c.bf16 %v388_v33, %v387_v31  ;;  %v389_v37 = vld [vmem:[%s1716_s4 + $0x70] sm:$0xff]  ;;  %v390_v39 = vld [vmem:[%s1716_s4 + $0x78] sm:$0xff] }
  0xa4   : > { %1000 = vmatprep.subr.bf16.mxu0 %v999_v9  ;;  %v1039_v38 = vpack.c.bf16 %v528_v35, %v527_v34  ;;  %v529_v40 = vld [vmem:[%s1730_s10 + $0x50] sm:$0xff]  ;;  %v530_v41 = vld [vmem:[%s1730_s10 + $0x58] sm:$0xff]  ;;  %v1019_v42 = vpack.c.bf16 %v390_v39, %v389_v37  ;;  %v531_v44 = vld [vmem:[%s1730_s10 + $0x60] sm:$0xff] }
  0xa5   : > { %v1043_v43 = vpack.c.bf16 %v530_v41, %v529_v40  ;;  %v532_v45 = vld [vmem:[%s1730_s10 + $0x68] sm:$0xff]  ;;  %v369_v48 = vld [vmem:[%s1708_s29 + $0x10] sm:$0xff]  ;;  %v370_v49 = vld [vmem:[%s1708_s29 + $0x18] sm:$0xff] }
  0xa6   : > { %1030 = vmatpush3.bf16.msra.mxu1 %v1027_v21  ;;  %v1047_v46 = vpack.c.bf16 %v532_v45, %v531_v44  ;;  %v368_v47 = vld [vmem:[%s1708_s29 + $0x8] sm:$0xff]  ;;  %v371_v50 = vld [vmem:[%s1708_s29 + $0x20] sm:$0xff]  ;;  %v373_v52 = vld [vmem:[%s1708_s29 + $0x30] sm:$0xff] }
  0xa7   : > { %1002 = vmatpush3.bf16.msra.mxu0 %v999_v9  ;;  %1032 = vmatprep.subr.bf16.mxu1 %v1031_v26  ;;  %v372_v51 = vld [vmem:[%s1708_s29 + $0x28] sm:$0xff]  ;;  %v374_v53 = vld [vmem:[%s1708_s29 + $0x38] sm:$0xff]  ;;  %v533_v54 = vld [vmem:[%s1730_s10 + $0x70] sm:$0xff] }
  0xa8   : > { %1004 = vmatprep.subr.bf16.mxu0 %v1003_v16  ;;  %v534_v55 = vld [vmem:[%s1730_s10 + $0x78] sm:$0xff]  ;;  %v845_v57 = vld [vmem:[%s345_s12] ss:$0 sm:$0xff]  ;;  %v512_v18 = vld [vmem:[#allocation2 + $0x8] sm:$0xff] }
  0xa9   : > { %v1051_v56 = vpack.c.bf16 %v534_v55, %v533_v54  ;;  %v511_v19 = vld [vmem:[#allocation2] sm:$0xff]  ;;  %v513_v25 = vld [vmem:[#allocation2 + $0x10] sm:$0xff] }
  0xaa   : > { %1034 = vmatpush3.bf16.msra.mxu1 %v1031_v26  ;;  %v515_v31 = vld [vmem:[#allocation2 + $0x20] sm:$0xff]  ;;  %v517_v37 = vld [vmem:[#allocation2 + $0x30] sm:$0xff] }
  0xab   : > { %1006 = vmatpush3.bf16.msra.mxu0 %v1003_v16  ;;  %1036 = vmatprep.subr.bf16.mxu1 %v1035_v32 }
  0xac   : > { %1008 = vmatprep.subr.bf16.mxu0 %v1007_v24 }
  0xae   : > { %1038 = vmatpush3.bf16.msra.mxu1 %v1035_v32 }
  0xaf   : > { %1010 = vmatpush3.bf16.msra.mxu0 %v1007_v24  ;;  %1040 = vmatprep.subr.bf16.mxu1 %v1039_v38  ;;  %v514_v24 = vld [vmem:[#allocation2 + $0x18] sm:$0xff] }
  0xb0   : > { %1012 = vmatprep.subr.bf16.mxu0 %v1011_v30 }
  0xb2   : > { %1042 = vmatpush3.bf16.msra.mxu1 %v1039_v38 }
  0xb3   : > { %1014 = vmatpush3.bf16.msra.mxu0 %v1011_v30  ;;  %1044 = vmatprep.subr.bf16.mxu1 %v1043_v43  ;;  %v516_v30 = vld [vmem:[#allocation2 + $0x28] sm:$0xff] }
  0xb4   : > { %1016 = vmatprep.subr.bf16.mxu0 %v1015_v36 }
  0xb6   : > { %1046 = vmatpush3.bf16.msra.mxu1 %v1043_v43 }
  0xb7   : > { %1018 = vmatpush3.bf16.msra.mxu0 %v1015_v36  ;;  %1048 = vmatprep.subr.bf16.mxu1 %v1047_v46  ;;  %v518_v36 = vld [vmem:[#allocation2 + $0x38] sm:$0xff] }
  0xb8   : > { %1020 = vmatprep.subr.bf16.mxu0 %v1019_v42 }
  0xba   : > { %1050 = vmatpush3.bf16.msra.mxu1 %v1047_v46 }
  0xbb   : > { %1022 = vmatpush3.bf16.msra.mxu0 %v1019_v42  ;;  %1052 = vmatprep.subr.bf16.mxu1 %v1051_v56 }
  0xbe   : > { %936 = vmatmul.mubr.f32.vlgmr.msra.gmra.mrb[0].mxu0 %v368_v47  ;;  %1054 = vmatpush3.bf16.msra.mxu1 %v1051_v56 }
  0xbf   : > { %938 = vmatprep.mubr.f32.mxu0 %v369_v48 }
  0xc2   : > { %939 = vmatmul.mubr.f32.gmra.mrb[2].mxu0 %v370_v49 }
  0xc3   : > { %941 = vmatprep.mubr.f32.mxu0 %v371_v50 }
  0xc6   : > { %942 = vmatmul.mubr.f32.gmra.mrb[4].mxu0 %v372_v51 }
  0xc7   : > { %944 = vmatprep.mubr.f32.mxu0 %v373_v52 }
  0xca   : > { %945 = vmatmul.mubr.f32.gmra.mrb[6].mxu0 %v374_v53 }
 0x191   : > { %v937_v58 = vpop.f32.mrb[0].mxu0 }
 0x192   : > { %v470_v59 = vadd.f32 %v937_v58, %v845_v57  ;;  %v464_v60 = vpop.f32.mrb[1].mxu0 }
 0x193   : > { %v465_v61 = vadd.f32 %v845_v57, %v464_v60 }
 0x194   : > { %v504_v0 = vmax.f32 %v470_v59, 0.0 }
 0x195   : > { %v940_v62 = vpop.f32.mrb[2].mxu0  ;;  %v503_v63 = vmax.f32 %v465_v61, 0.0 }
 0x196   : > { %v480_v1 = vadd.f32 %v940_v62, %v845_v57  ;;  %v474_v2 = vpop.f32.mrb[3].mxu0 }
 0x197   : > { %v475_v3 = vadd.f32 %v845_v57, %v474_v2  ;;  %979 = vmatprep.mubr.f32.mxu1 %v503_v63 }
 0x198   : > { %980 = vmatmul.mubr.f32.vlgmr.msra.gmra.mrb[0].mxu1 %v504_v0  ;;  %v506_v6 = vmax.f32 %v480_v1, 0.0 }
 0x199   : > { %v505_v4 = vmax.f32 %v475_v3, 0.0  ;;  %v943_v5 = vpop.f32.mrb[4].mxu0 }
 0x19a   : > { %v490_v7 = vadd.f32 %v943_v5, %v845_v57  ;;  %v484_v8 = vpop.f32.mrb[5].mxu0 }
 0x19b   : > { %v485_v9 = vadd.f32 %v845_v57, %v484_v8  ;;  %982 = vmatprep.mubr.f32.mxu1 %v505_v4 }
 0x19c   : > { %983 = vmatmul.mubr.f32.gmra.mrb[2].mxu1 %v506_v6  ;;  %v508_v12 = vmax.f32 %v490_v7, 0.0 }
 0x19d   : > { %v507_v10 = vmax.f32 %v485_v9, 0.0  ;;  %v946_v11 = vpop.f32.mrb[6].mxu0 }
 0x19e   : > { %v500_v13 = vadd.f32 %v946_v11, %v845_v57  ;;  %v494_v14 = vpop.f32.mrb[7].mxu0 }
 0x19f   : > { %v495_v15 = vadd.f32 %v845_v57, %v494_v14  ;;  %985 = vmatprep.mubr.f32.mxu1 %v507_v10 }
 0x1a0   : > { %986 = vmatmul.mubr.f32.gmra.mrb[4].mxu1 %v508_v12  ;;  %v510_v17 = vmax.f32 %v500_v13, 0.0 }
 0x1a1   : > { %v509_v16 = vmax.f32 %v495_v15, 0.0 }
 0x1a3   : > { %988 = vmatprep.mubr.f32.mxu1 %v509_v16 }
 0x1a4   : > { %989 = vmatmul.mubr.f32.gmra.mrb[6].mxu1 %v510_v17 }
 0x26b   : > { %v981_v20 = vpop.f32.mrb[0].mxu1 }
 0x26c   : > { %v641_v21 = vadd.f32 %v981_v20, %v512_v18  ;;  %v601_v22 = vpop.f32.mrb[1].mxu1 }
 0x26d   : > { %v640_v23 = vadd.f32 %v601_v22, %v511_v19 }
 0x26e   : > { %649 = vst [vmem:[#allocation2 + $0x8] sm:$0xff] %v641_v21 }
 0x26f   : > { %648 = vst [vmem:[#allocation2] sm:$0xff] %v640_v23  ;;  %v984_v26 = vpop.f32.mrb[2].mxu1 }
 0x270   : > { %v643_v27 = vadd.f32 %v984_v26, %v514_v24  ;;  %v611_v28 = vpop.f32.mrb[3].mxu1 }
 0x271   : > { %v642_v29 = vadd.f32 %v611_v28, %v513_v25 }
 0x272   : > { %651 = vst [vmem:[#allocation2 + $0x18] sm:$0xff] %v643_v27 }
 0x273   : > { %650 = vst [vmem:[#allocation2 + $0x10] sm:$0xff] %v642_v29  ;;  %v987_v32 = vpop.f32.mrb[4].mxu1 }
 0x274   : > { %v645_v33 = vadd.f32 %v987_v32, %v516_v30  ;;  %v621_v34 = vpop.f32.mrb[5].mxu1 }
 0x275   : > { %v644_v35 = vadd.f32 %v621_v34, %v515_v31  ;;  %659 = sbr.rel (%p846_p2) target bundleno = 644 (0x284), region = 60  ;;  %v661_v43 = vld [vmem:[#allocation2 + $0x8] sm:$0xff] (!%p846_p2) }
 0x276   : > { %653 = vst [vmem:[#allocation2 + $0x28] sm:$0xff] %v645_v33  ;;  %v660_v42 = vld [vmem:[#allocation2] sm:$0xff] (!%p846_p2)  ;;  %669 = vst [vmem:[%s1732_s20 + $0x8] sm:$0xff] (!%p846_p2), %v661_v43 }
 0x277   : > { %652 = vst [vmem:[#allocation2 + $0x20] sm:$0xff] %v644_v35  ;;  %v990_v38 = vpop.f32.mrb[6].mxu1  ;;  %668 = vst [vmem:[%s1732_s20] sm:$0xff] (!%p846_p2), %v660_v42 }
 0x278   : > { %v647_v39 = vadd.f32 %v990_v38, %v518_v36  ;;  %v631_v40 = vpop.f32.mrb[7].mxu1 }
 0x279   : > { %v646_v41 = vadd.f32 %v631_v40, %v517_v37  ;;  %v663_v45 = vld [vmem:[#allocation2 + $0x18] sm:$0xff] (!%p846_p2) }
 0x27a   : > { %655 = vst [vmem:[#allocation2 + $0x38] sm:$0xff] %v647_v39  ;;  %v662_v44 = vld [vmem:[#allocation2 + $0x10] sm:$0xff] (!%p846_p2)  ;;  %671 = vst [vmem:[%s1732_s20 + $0x18] sm:$0xff] (!%p846_p2), %v663_v45 }
 0x27b   : > { %654 = vst [vmem:[#allocation2 + $0x30] sm:$0xff] %v646_v41  ;;  %670 = vst [vmem:[%s1732_s20 + $0x10] sm:$0xff] (!%p846_p2), %v662_v44 }
 0x27d   : > { %v665_v47 = vld [vmem:[#allocation2 + $0x28] sm:$0xff] }
 0x27e   : > { %v664_v46 = vld [vmem:[#allocation2 + $0x20] sm:$0xff]  ;;  %673 = vst [vmem:[%s1732_s20 + $0x28] sm:$0xff] %v665_v47 }
 0x27f   : > { %672 = vst [vmem:[%s1732_s20 + $0x20] sm:$0xff] %v664_v46 }
 0x281   : > { %v667_v49 = vld [vmem:[#allocation2 + $0x38] sm:$0xff] }
 0x282   : > { %v666_v48 = vld [vmem:[#allocation2 + $0x30] sm:$0xff]  ;;  %675 = vst [vmem:[%s1732_s20 + $0x38] sm:$0xff] %v667_v49 }
 0x283   : > { %674 = vst [vmem:[%s1732_s20 + $0x30] sm:$0xff] %v666_v48 }
 0x284 PF: > { %s1917_s24 = sld [smem:[#allocation15_spill]]  ;;  %s690_s8 = sshll.u32 %s1732_s20, 4  ;;  %s1799_s8 = int_to_ptr.vmem [resolvable:$true] %s690_s8 }
 0x285   : > { %s1918_s6 = sld [smem:[#allocation23_spill]]  ;;  %s677_s23 = scalar_lea.sflag [#allocation5], %s1704_s1 }
 0x286   : > { %s1262_s4 = scalar_lea.vmem %s1799_s8, 1024  ;;  %p1919_p11 = scmp.ne.s32.totalorder %s1904_s14, 0 }
 0x287   : > { %p1263_p13 = scmp.ne.s32.totalorder %s1799_s8, %s1262_s4  ;;  %s1396_s15 = smov [#allocation9]  }
 0x288   : > { %s1266_s30 = sshll.u32 %s1396_s15, 4  ;;  %s1267_s30 = int_to_ptr.vmem [resolvable:$false] %s1266_s30 }
 0x289   : > { %p1264_p6 = pnand %p1263_p13, %p1919_p11  ;;  %s1268_s13 = scalar_lea.vmem %s1267_s30, 2048 }
 0x28a   : > { %s854_s27 = sshll.u32 %s1917_s24, 10  ;;  %p1269_p1 = scmp.lt.s32.totalorder %s1799_s8, %s1267_s30 }
 0x28b   : > { %s1796_s7 = scalar_lea.hbm %s1918_s6, %s854_s27  ;;  %p1265_p5 = pneg %p1264_p6 }
 0x28c   : > { %p1270_p0 = scmp.lt.s32.totalorder %s1268_s13, %s1262_s4 }
 0x28e   : > { %p1271_p9 = por %p1270_p0, %p1269_p1 }
 0x290   : > { %p1272_p12 = pnand %p1271_p9, %p1265_p5 }
 0x292   : > { %1275 = shalt.err (!%p1272_p12)
}
 0x293   : > { %s1276_s12 = scalar_lea.hbm %s1796_s7, 1024  ;;  %s1280_s25 = scalar_lea.hbm %s1918_s6, 2048 }
 0x294   : > { %p1277_p3 = scmp.ne.s32.totalorder %s1796_s7, %s1276_s12  ;;  %p1281_p8 = scmp.lt.u32.totalorder %s1796_s7, %s1918_s6 }
 0x295   : > { %p1282_p10 = scmp.lt.u32.totalorder %s1280_s25, %s1276_s12  ;;  %p1284_p13 = scmp.lt.u32.totalorder %s1276_s12, %s1796_s7 }
 0x296   : > { %p1278_p4 = pnand %p1277_p3, %p1919_p11 }
 0x297   : > { %p1283_p2 = por %p1282_p10, %p1281_p8 }
 0x298   : > { %p1279_p7 = pneg %p1278_p4 }
 0x299   : > { %p1285_p6 = por %p1284_p13, %p1283_p2 }
 0x29b   : > { %p1286_p5 = pnand %p1285_p6, %p1279_p7 }
 0x29d   : > { %1289 = shalt.err (!%p1286_p5)
}
 0x29e   : > { %s1397_s18 = smov 128   ;;  %s1398_s16 = smov 8  }
 0x29f   : > { %1061 = dma.vmem_to_hbm [thread:$0]  (%p1919_p11), %s1799_s8, 1024, %s1796_s7, %s677_s23, %s1397_s18, %s1397_s18, %s1398_s16  }
 0x2a0 PF: > { %p1078_p1 = scmp.ge.s32.totalorder %s1388_s28, 2  ;;  %s705_s24 = sand.u32 1, %s1360_s21  }
 0x2a1   : > { %p1920_p0 = scmp.ne.s32.totalorder %s1906_s5, 0  ;;  %s706_s27 = scalar_lea.sflag [#allocation5], %s705_s24 }
 0x2a3   : > { %p1074_p9 = pnand %p1078_p1, %p1920_p0 }
 0x2a5   : > { %1343 = dma.done.wait (!%p1074_p9), %s706_s27, 1024  }
 0x2a6   : > { %1345 = vsyncadd (!%p1074_p9), %s706_s27, 4294966272  ;;  %s24_s28 = sadd.s32 1, %s1388_s28   ;;  %s1921_s11 = sld [smem:[#allocation13_spill]] }
 0x2a7   : > { %p21_p12 = scmp.ge.s32.totalorder %s24_s28, 6   ;;  %s1922_s20 = sld [smem:[#allocation18_spill]] }
 0x2a8   : > { %s1923_s14 = sld [smem:[#allocation14_spill]]  ;;  %s1924_s23 = sld [smem:[#allocation20_spill]] }
 0x2a9   : > { %s1925_s25 = sld [smem:[#allocation16_spill]]  ;;  %s1926_s1 = sld [smem:[#allocation17_spill]] }
 0x2aa   : > { %s1927_s27 = sld [smem:[#allocation19_spill]]  ;;  %s1928_s18 = smov %s1352_s19 }
 0x2ab   : > { %s1930_s21 = smov %s1364_s22  ;;  %s1932_s24 = smov %s1380_s26 }
 0x2ac   : > { %s1929_s19 = smov %s1921_s11  ;;  %23 = sbr.rel (!%p21_p12) target bundleno = 15 (0xf), region = 120 }
 0x2ae   : > { %s1931_s22 = smov %s1923_s14 }
 0x2af   : > { %s1933_s26 = smov %s1926_s1 }
 0x2b3   :  { %711 = vsyncpa [#allocation4], 1 }
 0x2b4   :  { %713 = vsyncpa [#allocation4 + $0x1], 1 }
 0x2b5   :  { %714 = vsyncpa [#allocation7], 1 }
 0x2b6   :  { %716 = vsyncpa [#allocation7 + $0x1], 1 }
 0x2b7   :  { %717 = vsyncpa [#allocation5], 1 }
 0x2b8   :  { %719 = vsyncpa [#allocation5 + $0x1], 1 }

</bundles_post_ra>
